<compile_context>
chip_gen: v7x
topology: tpu7x:2x2x1
jax: 0.10.0
libtpu: 0.0.40
codegen_flags: <defaults>
</compile_context>

<pallas_src>
import jax
import jax.numpy as jnp
from jax.experimental import pallas as pl
from jax.experimental.pallas import tpu as pltpu


def _fcnet_kernel(xT_ref, w1t_ref, b1_ref, w2_ref, b2_ref, o_ref):
    # xT_ref : (S, TB)   input tile, batch on lanes
    # w1t_ref: (H, S)    layer-1 weight, resident
    # b1_ref : (H, 1)    layer-1 bias, broadcast over lanes
    # w2_ref : (H, 1)    layer-2 weight column, broadcast over lanes
    # b2_ref : (1,)      layer-2 bias scalar in SMEM
    # o_ref  : (1, TB)   lane-dense output tile

    # Layer 1: (H, S) x (S, TB) -> (H, TB) on the MXU, bias + ReLU on the VPU.
    h = jnp.dot(w1t_ref[...], xT_ref[...], preferred_element_type=jnp.float32)
    h = jnp.maximum(h + b1_ref[...], 0.0)

    # Layer 2: tiny N=1 reduction done as VPU multiply + cross-sublane sum
    # (keeps the MXU push slot and the store path free; important on v5e).
    y = jnp.sum(h * w2_ref[...], axis=0, keepdims=True)        # (1, TB)
    o_ref[...] = (y + b2_ref[0]).astype(o_ref.dtype)


def fcnet_forward(x, w1, b1, w2, b2, *, tb=512):
    """Fused MLP forward.

    x : (B, S) float32/bf16
    w1: (S, H), b1: (H,), w2: (H, 1), b2: (1,)   (torch weights transposed)
    returns (B,)  -- matches FCNet(...).squeeze() for B > 1.
    """
    B, S = x.shape
    H = w1.shape[1]
    assert w1.shape == (S, H) and w2.shape == (H, 1)

    # Wrapper-side layout plumbing: batch -> lane axis.
    xT = x.T                                   # (S, B)
    w1t = w1.T                                 # (H, S)
    b1c = b1.reshape(H, 1)
    w2c = w2.reshape(H, 1)
    b2s = b2.reshape(1).astype(jnp.float32)    # scalar, lives in SMEM

    if B <= tb:
        # Single full-batch block (block dims == array dims is always legal).
        TB, B_pad = B, B
    else:
        assert tb % 128 == 0, "batch tile must be a multiple of 128 lanes"
        TB = tb
        B_pad = pl.cdiv(B, TB) * TB
        if B_pad != B:
            xT = jnp.pad(xT, ((0, 0), (0, B_pad - B)))

    num_blocks = B_pad // TB

    out = pl.pallas_call(
        _fcnet_kernel,
        out_shape=jax.ShapeDtypeStruct((1, B_pad), jnp.float32),
        grid=(num_blocks,),
        in_specs=[
            # x tile marches along the batch grid axis.
            pl.BlockSpec((S, TB), lambda i: (0, i)),
            # Weights / biases: constant index_map -> stay resident in VMEM.
            pl.BlockSpec((H, S), lambda i: (0, 0)),
            pl.BlockSpec((H, 1), lambda i: (0, 0)),
            pl.BlockSpec((H, 1), lambda i: (0, 0)),
            # Scalar bias via SMEM (no padded VMEM tile, no vector load).
            pl.BlockSpec(memory_space=pltpu.MemorySpace.SMEM),
        ],
        out_specs=pl.BlockSpec((1, TB), lambda i: (0, i)),
        compiler_params=pltpu.CompilerParams(
            # Batch grid axis is independent -> megacore-shardable on v7x.
            dimension_semantics=("parallel",),
        ),
    )(xT, w1t, b1c, w2c, b2s)

    # torch's .squeeze() drops the trailing size-1 dim: (B, 1) -> (B,).
    return out[0, :B]


def init_fcnet_params(key, seq_len, hidden=32):
    """Deterministic init mimicking torch.nn.Linear (uniform +/- 1/sqrt(fan_in))."""
    k1, k2, k3, k4 = jax.random.split(key, 4)
    bound1 = 1.0 / jnp.sqrt(seq_len)
    bound2 = 1.0 / jnp.sqrt(hidden)
    w1 = jax.random.uniform(k1, (seq_len, hidden), jnp.float32, -bound1, bound1)
    b1 = jax.random.uniform(k2, (hidden,), jnp.float32, -bound1, bound1)
    w2 = jax.random.uniform(k3, (hidden, 1), jnp.float32, -bound2, bound2)
    b2 = jax.random.uniform(k4, (1,), jnp.float32, -bound2, bound2)
    return w1, b1, w2, b2


def _reference(x, w1, b1, w2, b2):
    return jnp.squeeze(
        jnp.maximum(x @ w1 + b1[None, :], 0.0) @ w2 + b2[None, :], axis=-1
    )


if __name__ == "__main__":
    SEQ_LEN = 8
    HIDDEN = 32

    key = jax.random.PRNGKey(0)
    kx1, kx2, kp = jax.random.split(key, 3)
    w1, b1, w2, b2 = init_fcnet_params(kp, SEQ_LEN, HIDDEN)

    # Case 1: tiny batch (matches the original module's toy usage) -> single block.
    x_small = jax.random.normal(kx1, (8, SEQ_LEN), jnp.float32)
    y_small = fcnet_forward(x_small, w1, b1, w2, b2)
    jax.block_until_ready(y_small)
    assert y_small.shape == (8,)
    assert jnp.allclose(y_small, _reference(x_small, w1, b1, w2, b2),
                        atol=1e-5, rtol=1e-5)

    # Case 2: exercises the gridded, lane-dense (TB multiple of 128) path.
    x_big = jax.random.normal(kx2, (256, SEQ_LEN), jnp.float32)
    y_big = fcnet_forward(x_big, w1, b1, w2, b2, tb=128)
    jax.block_until_ready(y_big)
    assert y_big.shape == (256,)
    assert jnp.allclose(y_big, _reference(x_big, w1, b1, w2, b2),
                        atol=1e-5, rtol=1e-5)

    print("KERNEL_OK")
</pallas_src>

<mosaic_0001>
module attributes {stable_mosaic.version = 11 : i64} {
  func.func @_fcnet_kernel(%arg0: i32, %arg1: memref<8x8xf32, #tpu.memory_space<vmem>>, %arg2: memref<32x8xf32, #tpu.memory_space<vmem>>, %arg3: memref<32x1xf32, #tpu.memory_space<vmem>>, %arg4: memref<32x1xf32, #tpu.memory_space<vmem>>, %arg5: memref<1xf32, #tpu.memory_space<smem>>, %arg6: memref<1x8xf32, #tpu.memory_space<vmem>>) attributes {dimension_semantics = [#tpu.dimension_semantics<parallel>], iteration_bounds = array<i64: 1>, scalar_prefetch = 0 : i64, scratch_operands = 0 : i64, tpu.core_type = #tpu.core_type<tc>, window_params = [{transform_indices = @transform_0, window_bounds = array<i64: 8, 8>}, {pipeline_mode = #tpu.pipeline_mode<synchronous>, transform_indices = @transform_1, window_bounds = array<i64: 32, 8>}, {pipeline_mode = #tpu.pipeline_mode<synchronous>, transform_indices = @transform_2, window_bounds = array<i64: 32, 1>}, {pipeline_mode = #tpu.pipeline_mode<synchronous>, transform_indices = @transform_3, window_bounds = array<i64: 32, 1>}, {transform_indices = @transform_4, window_bounds = array<i64: 1>}, {transform_indices = @transform_5, window_bounds = array<i64: 1, 8>}]} {
    %c0 = arith.constant 0 : index
    %c0_0 = arith.constant 0 : index
    %0 = vector.load %arg2[%c0, %c0_0] : memref<32x8xf32, #tpu.memory_space<vmem>>, vector<32x8xf32>
    %c0_1 = arith.constant 0 : index
    %c0_2 = arith.constant 0 : index
    %1 = vector.load %arg1[%c0_1, %c0_2] : memref<8x8xf32, #tpu.memory_space<vmem>>, vector<8x8xf32>
    %cst = arith.constant dense<0.000000e+00> : vector<32x8xf32>
    %2 = tpu.matmul %0, %1, %cst {dimension_numbers = #tpu.dot_dimension_numbers<[1], [0], [0], [1], [0, 0, 1, 1], [], []>} : vector<32x8xf32>, vector<8x8xf32>, vector<32x8xf32> -> vector<32x8xf32>
    %c0_3 = arith.constant 0 : index
    %c0_4 = arith.constant 0 : index
    %3 = vector.load %arg3[%c0_3, %c0_4] : memref<32x1xf32, #tpu.memory_space<vmem>>, vector<32x1xf32>
    %4 = vector.broadcast %3 : vector<32x1xf32> to vector<32x8xf32>
    %5 = arith.addf %2, %4 : vector<32x8xf32>
    %cst_5 = arith.constant 0.000000e+00 : f32
    %6 = vector.broadcast %cst_5 : f32 to vector<32x8xf32>
    %7 = arith.maximumf %5, %6 : vector<32x8xf32>
    %c0_6 = arith.constant 0 : index
    %c0_7 = arith.constant 0 : index
    %8 = vector.load %arg4[%c0_6, %c0_7] : memref<32x1xf32, #tpu.memory_space<vmem>>, vector<32x1xf32>
    %9 = vector.broadcast %8 : vector<32x1xf32> to vector<32x8xf32>
    %10 = arith.mulf %7, %9 : vector<32x8xf32>
    %cst_8 = arith.constant dense<0.000000e+00> : vector<8xf32>
    %11 = vector.multi_reduction <add>, %10, %cst_8 [0] : vector<32x8xf32> to vector<8xf32>
    %12 = vector.shape_cast %11 : vector<8xf32> to vector<1x8xf32>
    %c0_9 = arith.constant 0 : index
    %13 = memref.load %arg5[%c0_9] : memref<1xf32, #tpu.memory_space<smem>>
    %14 = vector.broadcast %13 : f32 to vector<1x8xf32>
    %15 = arith.addf %12, %14 : vector<1x8xf32>
    %c0_10 = arith.constant 0 : index
    %c0_11 = arith.constant 0 : index
    %16 = vector.load %arg6[%c0_10, %c0_11] : memref<1x8xf32, #tpu.memory_space<vmem>>, vector<1x8xf32>
    tpu.vector_store %arg6[%c0_10, %c0_11], %15 {strides = array<i32>} : memref<1x8xf32, #tpu.memory_space<vmem>>, vector<1x8xf32>,
    return
  }
  func.func @transform_0(%arg0: i32) -> (i32, i32) {
    %c0_i32 = arith.constant 0 : i32
    %c0_i32_0 = arith.constant 0 : i32
    return %c0_i32, %arg0 : i32, i32
  }
  func.func @transform_1(%arg0: i32) -> (i32, i32) {
    %c0_i32 = arith.constant 0 : i32
    %c0_i32_0 = arith.constant 0 : i32
    %c0_i32_1 = arith.constant 0 : i32
    return %c0_i32, %c0_i32_0 : i32, i32
  }
  func.func @transform_2(%arg0: i32) -> (i32, i32) {
    %c0_i32 = arith.constant 0 : i32
    %c0_i32_0 = arith.constant 0 : i32
    %c0_i32_1 = arith.constant 0 : i32
    return %c0_i32, %c0_i32_0 : i32, i32
  }
  func.func @transform_3(%arg0: i32) -> (i32, i32) {
    %c0_i32 = arith.constant 0 : i32
    %c0_i32_0 = arith.constant 0 : i32
    %c0_i32_1 = arith.constant 0 : i32
    return %c0_i32, %c0_i32_0 : i32, i32
  }
  func.func @transform_4(%arg0: i32) -> i32 {
    %c0_i32 = arith.constant 0 : i32
    %c0_i32_0 = arith.constant 0 : i32
    return %c0_i32 : i32
  }
  func.func @transform_5(%arg0: i32) -> (i32, i32) {
    %c0_i32 = arith.constant 0 : i32
    %c0_i32_0 = arith.constant 0 : i32
    return %c0_i32, %arg0 : i32, i32
  }
}

</mosaic_0001>

<bundles_post_ra>
// kernel: tpu_custom_call.1
= control target key start
LH: loop header
LB: loop body
LE: loop exit
PB: predicated region body
PF: predicated region fallthrough
CT: control target
= control target key end

     0   :  { %vm51_vm0 = vcmask 64512   ;;  %s354_s0 = inlined_call_operand.vmem [shape: f32[8,8], index: 0, kind: input, shape index: {}]   ;;  %s355_s1 = inlined_call_operand.vmem [shape: f32[32,8], index: 1, kind: input, shape index: {}]   ;;  %s356_s2 = inlined_call_operand.vmem [shape: f32[32,1], index: 2, kind: input, shape index: {}]   ;;  %s357_s3 = inlined_call_operand.vmem [shape: f32[32,1], index: 3, kind: input, shape index: {}]   ;;  %s358_s4 = inlined_call_operand.<no memory space> [shape: f32[1], index: 4, kind: input, shape index: {}]   ;;  %s359_s5 = inlined_call_operand.hbm [shape: f32[1,8], index: 5, kind: output, shape index: {}]  }
   0x1   :  { %v26_v0 = vld [vmem:[%s354_s0] sm:$0xff]  ;;  %v24_v2 = vld [vmem:[%s355_s1 + $0x10] sm:$0xff]  ;;  %v23_v3 = vld [vmem:[%s355_s1 + $0x8] sm:$0xff] }
   0x2   :  { %v22_v1 = vld [vmem:[%s355_s1] sm:$0xff]  ;;  %222 = vmatprep.subr.mxu0 %v26_v0  ;;  %230 = vmatprep.subr.mxu1 %v26_v0  ;;  %v25_v4 = vld [vmem:[%s355_s1 + $0x18] sm:$0xff]  ;;  %v29_v6 = vld [vmem:[%s356_s2 + $0x10] sm:$0xff] }
   0x3   :  { %223 = vmatpush3.msra.mxu0 %v26_v0  ;;  %231 = vmatpush3.msra.mxu1 %v26_v0  ;;  %v27_v5 = vld [vmem:[%s356_s2] sm:$0xff] }
   0x4   :  { %224 = vmatprep.mubr.msk.f32.mxu0 %vm51_vm0, %v22_v1  ;;  %227 = vmatprep.mubr.msk.f32.mxu1 %vm51_vm0, %v24_v2 }
   0x5   :  { %225 = vmatmul.mubr.msk.f32.vlgmr.msra.gmra.mrb[0].mxu0 %vm51_vm0, %v23_v3  ;;  %228 = vmatmul.mubr.msk.f32.vlgmr.msra.gmra.mrb[0].mxu1 %vm51_vm0, %v25_v4 }
   0x6   :  { %11 = vsyncpa [#allocation4], 0  ;;  %v260_v7 = vmov 0   ;;  %v28_v8 = vld [vmem:[%s356_s2 + $0x8] sm:$0xff]  ;;  %v30_v9 = vld [vmem:[%s356_s2 + $0x18] sm:$0xff]  ;;  %v195_v50 = vstv %s358_s4  ;;  %s261_s17 = smov [#allocation3]  }
   0x7   :  { %234 = vset.pattern.permute.xlu0 %v260_v7  ;;  %235 = vset.pattern.permute.xlu1 %v260_v7  ;;  %v153_v10 = vld [vmem:[%s357_s3] sm:$0xff]  ;;  %v154_v11 = vld [vmem:[%s357_s3 + $0x8] sm:$0xff]  ;;  %v155_v12 = vld [vmem:[%s357_s3 + $0x10] sm:$0xff]  ;;  %s205_s18 = sshll.u32 %s261_s17, 4  ;;  %vm197_vm1 = vcmask 57344   ;;  %s206_s18 = int_to_ptr.vmem [resolvable:$true] %s205_s18 }
   0x8   :  { %33 = vperm.xlu0 %234, %v27_v5   ;;  %43 = vperm.xlu1 %235, %v29_v6   ;;  %v156_v13 = vld [vmem:[%s357_s3 + $0x18] sm:$0xff]  ;;  %s236_s19 = scalar_lea.vmem %s206_s18, 16  ;;  %s240_s20 = scalar_lea.vmem %s206_s18, 32 }
   0x9   :  { %p237_p0 = scmp.ne.s32.totalorder %s206_s18, %s236_s19  ;;  %p241_p1 = scmp.lt.s32.totalorder %s206_s18, %s206_s18 }
   0xa   :  { %p242_p2 = scmp.lt.s32.totalorder %s240_s20, %s236_s19 }
   0xc   :  { %38 = vperm.xlu0 %234, %v28_v8   ;;  %48 = vperm.xlu1 %235, %v30_v9   ;;  %p243_p3 = por %p242_p2, %p241_p1 }
   0xe   :  { %p244_p4 = pnand %p243_p3, %p237_p0 }
  0x10   :  { %159 = vperm.xlu0 %234, %v153_v10   ;;  %164 = vperm.xlu1 %235, %v154_v11  }
  0x14   :  { %169 = vperm.xlu0 %234, %v155_v12   ;;  %174 = vperm.xlu1 %235, %v156_v13  }
  0x87   :  { %v34_v14 = vpop.permute.xlu0 %33  ;;  %v44_v15 = vpop.permute.xlu1 %43 }
  0x8b   :  { %v39_v16 = vpop.permute.xlu0 %38  ;;  %v49_v17 = vpop.permute.xlu1 %48 }
  0x8f   :  { %v160_v18 = vpop.permute.xlu0 %159  ;;  %v165_v19 = vpop.permute.xlu1 %164 }
  0x93   :  { %v170_v32 = vpop.permute.xlu0 %169  ;;  %v175_v36 = vpop.permute.xlu1 %174 }
  0xd8   :  { %v226_v20 = vpop.f32.mrb[0].mxu0  ;;  %v229_v21 = vpop.f32.mrb[0].mxu1 }
  0xd9   :  { %v136_v22 = vadd.f32 %v226_v20, %v39_v16  ;;  %v146_v23 = vadd.f32 %v229_v21, %v49_v17  ;;  %v130_v24 = vpop.f32.mrb[1].mxu0  ;;  %v140_v25 = vpop.f32.mrb[1].mxu1 }
  0xda   :  { %v131_v26 = vadd.f32 %v130_v24, %v34_v14  ;;  %v141_v27 = vadd.f32 %v140_v25, %v44_v15 }
  0xdb   :  { %v150_v28 = vmax.f32 %v136_v22, 0.0  ;;  %v152_v29 = vmax.f32 %v146_v23, 0.0 }
  0xdc   :  { %v149_v30 = vmax.f32 %v131_v26, 0.0  ;;  %v151_v31 = vmax.f32 %v141_v27, 0.0 }
  0xdd   :  { %v178_v33 = vmul.f32 %v165_v19, %v150_v28  ;;  %v180_v38 = vmul.f32 %v175_v36, %v152_v29 }
  0xde   :  { %v177_v34 = vmul.f32 %v160_v18, %v149_v30  ;;  %v179_v35 = vmul.f32 %v170_v32, %v151_v31 }
  0xdf   :  { %v182_v37 = vsel %vm51_vm0, %v178_v33, 0.0  ;;  %v186_v43 = vsel %vm51_vm0, %v180_v38, 0.0 }
  0xe0   :  { %v181_v39 = vsel %vm51_vm0, %v177_v34, 0.0  ;;  %v184_v41 = vsel %vm51_vm0, %v179_v35, 0.0 }
  0xe1   :  { %v183_v40 = vadd.f32 %v182_v37, %v181_v39 }
  0xe3   :  { %v185_v42 = vadd.f32 %v184_v41, %v183_v40 }
  0xe5   :  { %v187_v44 = vadd.f32 %v186_v43, %v185_v42 }
  0xe7   :  { %v188_v45 = vrot.slane %v187_v44, 4 }
  0xe9   :  { %v189_v46 = vadd.f32 %v188_v45, %v187_v44 }
  0xeb   :  { %v190_v47 = vrot.slane %v189_v46, 2 }
  0xed   :  { %v191_v48 = vadd.f32 %v190_v47, %v189_v46 }
  0xef   :  { %v192_v49 = vrot.slane %v191_v48, 1 }
  0xf1   :  { %v193_v51 = vadd.f32 %v192_v49, %v191_v48 }
  0xf3   :  { %v196_v52 = vadd.f32 %v195_v50, %v193_v51 }
  0xf5   :  { %198 = vst.msk [vmem:[#allocation3] sm:$0x1] %vm197_vm1, %v196_v52 }
  0xf6   :  { %247 = shalt.err (!%p244_p4)
}
  0xf7   :  { %s248_s23 = scalar_lea.hbm %s359_s5, 16 }
  0xf8   :  { %p249_p5 = scmp.ne.s32.totalorder %s359_s5, %s248_s23  ;;  %p252_p6 = scmp.lt.u32.totalorder %s248_s23, %s359_s5 }
  0xfa   :  { %p254_p7 = pnand %p252_p6, %p249_p5 }
  0xfc   :  { %257 = shalt.err (!%p254_p7)
}
  0xfd   :  { %208 = dma.vmem_to_hbm [thread:$0]  %s206_s18, 16, %s359_s5, [#allocation4]  }
  0xfe   :  { %258 = dma.done.wait [#allocation4], 16  }
  0xff   :  { %259 = vsyncadd [#allocation4], 4294967280 }
 0x100   :  { %212 = vsyncpa [#allocation4], 1 }

</bundles_post_ra>
